<compile_context>
chip_gen: v5e
topology: v5e:2x2
jax: 0.10.0
libtpu: 0.0.40
codegen_flags: <defaults>
</compile_context>

<pallas_src>
import jax
import jax.numpy as jnp
from jax.experimental import pallas as pl
from jax.experimental.pallas import tpu as pltpu

LANE = 128
_ONE_SIXTH = float(1.0 / 6.0)

_BLOCK_BYTES = 8 * 1024 * 1024        # ~8 MiB input block per grid step
_VMEM_LIMIT_BYTES = 48 * 1024 * 1024  # 32 MiB double-buffered + headroom (<64 MiB v7x)
_SMALL_REMAINDER_ELEMS = 16 * 1024    # below this, slice+concat overhead dominates


def _h_sigmoid_kernel(x_ref, o_ref):
    # relu6(x + 3) * (1/6), computed in f32 for accuracy regardless of input
    # dtype.  Multiply-by-constant instead of divide: one VALU op, no EUP
    # reciprocal/Newton sequence (differs from a strict divide by <= 1 ulp).
    x = x_ref[...].astype(jnp.float32)
    y = jnp.clip(x + 3.0, 0.0, 6.0) * _ONE_SIXTH
    o_ref[...] = y.astype(o_ref.dtype)


def _h_sigmoid_jnp(x):
    xf = x.astype(jnp.float32)
    return (jnp.clip(xf + 3.0, 0.0, 6.0) / 6.0).astype(x.dtype)


def _sublane_for(dtype) -> int:
    # Native sublane tile: 8 rows for 4-byte, 16 for 2-byte, 32 for 1-byte.
    itemsize = jnp.dtype(dtype).itemsize
    return max(8, 32 // max(itemsize, 1))


def _round_up(n: int, m: int) -> int:
    return ((n + m - 1) // m) * m


def _num_tensorcores() -> int:
    """Best-effort TensorCore-per-device count (v7x / v4 / v5p megacore = 2)."""
    try:
        kind = jax.devices()[0].device_kind.lower()
    except Exception:
        return 1
    if any(tag in kind for tag in ("7", "v4", "v5p")):
        return 2
    return 1


def _run_slab(x2d: jax.Array, *, block_bytes: int = _BLOCK_BYTES) -> jax.Array:
    """Elementwise h_sigmoid over a lane-dense 2D slab (rows, C)."""
    rows, C = x2d.shape
    dtype = x2d.dtype
    itemsize = jnp.dtype(dtype).itemsize
    sublane = _sublane_for(dtype)
    num_cores = _num_tensorcores()

    # Row tile sized for ~block_bytes per block, rounded to the native sublane
    # tile.  With in+out double-buffered, VMEM ~= 4x block bytes (~32 MiB),
    # under every generation's physical budget (incl. v7x 64 MiB/TC).
    tr = max(sublane, (block_bytes // (C * itemsize)) // sublane * sublane)
    tr = min(tr, rows)

    # Multi-core chips: keep >= 2 grid steps so both TensorCores get work on
    # the "parallel" axis.  Single-core chips: skip (extra step = pure cost).
    if num_cores >= 2 and tr >= rows and rows >= 2 * sublane:
        tr = _round_up(rows // 2, sublane)

    # Load balance: make the step count a multiple of the core count so one
    # core never sits idle for a whole step on mid-size tensors.
    steps = pl.cdiv(rows, tr)
    if num_cores >= 2 and steps > 1 and steps % num_cores != 0:
        target = _round_up(steps, num_cores)
        tr = max(sublane, _round_up(pl.cdiv(rows, target), sublane))
        steps = pl.cdiv(rows, tr)

    return pl.pallas_call(
        _h_sigmoid_kernel,
        out_shape=jax.ShapeDtypeStruct((rows, C), dtype),
        grid_spec=pltpu.PrefetchScalarGridSpec(
            num_scalar_prefetch=0,
            grid=(steps,),  # partial last block handled by Pallas
            in_specs=[pl.BlockSpec((tr, C), lambda i: (i, 0))],
            out_specs=pl.BlockSpec((tr, C), lambda i: (i, 0)),
        ),
        compiler_params=pltpu.CompilerParams(
            # "parallel" lets the runtime shard the row-block axis across
            # TensorCores on megacore/v7x parts; harmless on single-core chips.
            dimension_semantics=("parallel",),
            vmem_limit_bytes=_VMEM_LIMIT_BYTES,
        ),
    )(x2d)


def h_sigmoid(x: jax.Array) -> jax.Array:
    """Elementwise hard sigmoid (relu6(x+3)/6) on any-shape tensor (e.g. NCHW)."""
    orig_shape = x.shape
    dtype = x.dtype
    total = x.size
    if total == 0:
        return x

    sublane = _sublane_for(dtype)
    base = sublane * LANE  # native (sublane, 128) tile element count

    if total < base:
        # Tiny tensor: a kernel launch is pure overhead.
        return _h_sigmoid_jnp(x)

    flat = jnp.ravel(x)  # layout-preserving; no data movement
    main = (total // base) * base

    # Wide lane-dense slab: pick the widest C = 128*k (k up to 64 -> C up to
    # 8192) that exactly factors `main` with rows a multiple of the sublane
    # tile.  k=1 always works, so there is no degenerate fallback.
    units = main // base
    k = 1
    for cand in (64, 32, 16, 8, 4, 2):
        if units % cand == 0:
            k = cand
            break
    C = LANE * k
    rows = main // C  # = (units // k) * sublane -> sublane-aligned

    if main == total:
        # Fast path (typical NCHW activations): pure reshape, no pad, no
        # output slice -> exactly 1 HBM read + 1 HBM write.
        out2d = _run_slab(flat.reshape(rows, C))
        return out2d.reshape(orig_shape)

    # Remainder path (total not a multiple of sublane*128).
    if total < _SMALL_REMAINDER_ELEMS:
        # slice + kernel + concat costs ~3 HBM passes plus launch overhead;
        # for small tensors a single fused jnp pass is strictly cheaper.
        return _h_sigmoid_jnp(x)

    # TODO(synk): large non-divisible tensors still pay extra HBM passes for
    # the input slice and output concatenate; writing the main slab straight
    # into a full-size aliased flat output would remove them.
    out_main = _run_slab(flat[:main].reshape(rows, C)).reshape(-1)
    out_tail = _h_sigmoid_jnp(flat[main:])
    return jnp.concatenate([out_main, out_tail]).reshape(orig_shape)


def h_sigmoid_ref(x: jax.Array) -> jax.Array:
    return (jnp.clip(x.astype(jnp.float32) + 3.0, 0.0, 6.0) / 6.0).astype(x.dtype)


if __name__ == "__main__":
    key = jax.random.PRNGKey(0)

    # NCHW activation, same convention as the PyTorch module's typical input.
    x = jax.random.normal(key, (2, 4, 16, 16), dtype=jnp.float32) * 4.0
    y = h_sigmoid(x)
    jax.block_until_ready(y)
    y_ref = h_sigmoid_ref(x)
    assert y.shape == x.shape and y.dtype == x.dtype
    assert jnp.allclose(y, y_ref, atol=1e-6, rtol=1e-6)

    # Larger non-tile-divisible tensor: exercises the kernel remainder path.
    x2 = jax.random.normal(jax.random.PRNGKey(1), (2, 4, 50, 50), dtype=jnp.float32) * 4.0
    y2 = h_sigmoid(x2)
    jax.block_until_ready(y2)
    assert jnp.allclose(y2, h_sigmoid_ref(x2), atol=1e-6, rtol=1e-6)

    # Small non-divisible tensor: exercises the fused-jnp remainder fallback.
    x3 = jax.random.normal(jax.random.PRNGKey(2), (3, 5, 7, 11), dtype=jnp.float32) * 4.0
    y3 = h_sigmoid(x3)
    jax.block_until_ready(y3)
    assert jnp.allclose(y3, h_sigmoid_ref(x3), atol=1e-6, rtol=1e-6)

    # bf16 coverage (2-byte sublane tiling path).
    xb = (jax.random.normal(jax.random.PRNGKey(3), (2, 4, 16, 16)) * 4.0).astype(jnp.bfloat16)
    yb = h_sigmoid(xb)
    jax.block_until_ready(yb)
    assert yb.dtype == jnp.bfloat16
    assert jnp.allclose(yb.astype(jnp.float32), h_sigmoid_ref(xb).astype(jnp.float32),
                        atol=1e-2, rtol=1e-2)

    print("KERNEL_OK")
</pallas_src>

<mosaic_0001>
module attributes {stable_mosaic.version = 11 : i64} {
  func.func @_h_sigmoid_kernel(%arg0: i32, %arg1: memref<8x256xf32, #tpu.memory_space<vmem>>, %arg2: memref<8x256xf32, #tpu.memory_space<vmem>>) attributes {dimension_semantics = [#tpu.dimension_semantics<parallel>], iteration_bounds = array<i64: 1>, scalar_prefetch = 0 : i64, scratch_operands = 0 : i64, tpu.core_type = #tpu.core_type<tc>, window_params = [{transform_indices = @transform_0, window_bounds = array<i64: 8, 256>}, {transform_indices = @transform_1, window_bounds = array<i64: 8, 256>}]} {
    %c0 = arith.constant 0 : index
    %c0_0 = arith.constant 0 : index
    %0 = vector.load %arg1[%c0, %c0_0] : memref<8x256xf32, #tpu.memory_space<vmem>>, vector<8x256xf32>
    %cst = arith.constant 3.000000e+00 : f32
    %1 = vector.broadcast %cst : f32 to vector<8x256xf32>
    %2 = arith.addf %0, %1 : vector<8x256xf32>
    %cst_1 = arith.constant 0.000000e+00 : f32
    %cst_2 = arith.constant 6.000000e+00 : f32
    %3 = vector.broadcast %cst_1 : f32 to vector<8x256xf32>
    %4 = arith.maximumf %3, %2 : vector<8x256xf32>
    %5 = vector.broadcast %cst_2 : f32 to vector<8x256xf32>
    %6 = arith.minimumf %5, %4 : vector<8x256xf32>
    %cst_3 = arith.constant 0.166666672 : f32
    %7 = vector.broadcast %cst_3 : f32 to vector<8x256xf32>
    %8 = arith.mulf %6, %7 : vector<8x256xf32>
    %c0_4 = arith.constant 0 : index
    %c0_5 = arith.constant 0 : index
    %9 = vector.load %arg2[%c0_4, %c0_5] : memref<8x256xf32, #tpu.memory_space<vmem>>, vector<8x256xf32>
    tpu.vector_store %arg2[%c0_4, %c0_5], %8 {strides = array<i32>} : memref<8x256xf32, #tpu.memory_space<vmem>>, vector<8x256xf32>,
    return
  }
  func.func @transform_0(%arg0: i32) -> (i32, i32) {
    %c0_i32 = arith.constant 0 : i32
    %c0_i32_0 = arith.constant 0 : i32
    return %arg0, %c0_i32 : i32, i32
  }
  func.func @transform_1(%arg0: i32) -> (i32, i32) {
    %c0_i32 = arith.constant 0 : i32
    %c0_i32_0 = arith.constant 0 : i32
    return %arg0, %c0_i32 : i32, i32
  }
}

</mosaic_0001>

<bundles_post_ra>
// kernel: tpu_custom_call.1
= control target key start
LH: loop header
LB: loop body
LE: loop exit
PB: predicated region body
PF: predicated region fallthrough
CT: control target
= control target key end

     0   :  { %6 = vsyncpa [#allocation3], 0  ;;  %s124_s0 = inlined_call_operand.hbm [shape: f32[8,256], index: 0, kind: input, shape index: {}]   ;;  %s125_s1 = inlined_call_operand.hbm [shape: f32[8,256], index: 1, kind: output, shape index: {}]  }
   0x1   :  { %7 = vsyncpa [#allocation4], 0  ;;  %s13_s8 = sshll.u32 %s124_s0, 4  ;;  %s106_s9 = smov [#allocation2]   ;;  %s14_s8 = int_to_ptr.hbm [resolvable:$true] %s13_s8 }
   0x2   :  { %s15_s10 = sshll.u32 %s106_s9, 4  ;;  %s16_s10 = int_to_ptr.vmem [resolvable:$true] %s15_s10 }
   0x3   :  { %18 = dma.hbm_to_vmem [thread:$0]  %s14_s8, 256, %s16_s10, [#allocation3]  }
   0x4   :  { %102 = dma.done.wait [#allocation3], 256  }
   0x5   :  { %103 = vsyncadd [#allocation3], 4294967040  ;;  %v23_v0 = vld [vmem:[#allocation2] sm:$0xff]  ;;  %v24_v1 = vld [vmem:[#allocation2 + $0x8] sm:$0xff]  ;;  %s107_s11 = smov [#allocation5]   ;;  %s42_s0 = sshll.u32 %s125_s1, 4  ;;  %s43_s0 = int_to_ptr.hbm [resolvable:$true] %s42_s0 }
   0x6   :  { %v25_v2 = vadd.f32 3.0, %v23_v0  ;;  %v26_v3 = vadd.f32 3.0, %v24_v1  ;;  %s40_s12 = sshll.u32 %s107_s11, 4  ;;  %s41_s12 = int_to_ptr.vmem [resolvable:$true] %s40_s12 }
   0x8   :  { %v27_v4 = vmax.f32 %v25_v2, 0.0  ;;  %v28_v5 = vmax.f32 %v26_v3, 0.0 }
   0xa   :  { %v29_v6 = vmin.f32 %v27_v4, 6.0  ;;  %v30_v7 = vmin.f32 %v28_v5, 6.0 }
   0xc   :  { %v31_v8 = vmul.f32 0.16666667, %v29_v6  ;;  %v32_v9 = vmul.f32 0.16666667, %v30_v7 }
   0xe   :  { %33 = vst [vmem:[#allocation5] sm:$0xff] %v31_v8 }
   0xf   :  { %34 = vst [vmem:[#allocation5 + $0x8] sm:$0xff] %v32_v9 }
  0x10   :  { %45 = dma.vmem_to_hbm [thread:$0]  %s41_s12, 256, %s43_s0, [#allocation4]  }
  0x11   :  { %104 = dma.done.wait [#allocation4], 256  }
  0x12   :  { %105 = vsyncadd [#allocation4], 4294967040 }
  0x13   :  { %50 = vsyncpa [#allocation3], 1 }
  0x14   :  { %51 = vsyncpa [#allocation4], 1 }

</bundles_post_ra>
